<compile_context>
chip_gen: v5e
topology: v5e:2x2
jax: 0.10.0
libtpu: 0.0.40
codegen_flags: <defaults>
</compile_context>

<pallas_src>
import functools

import numpy as np
import jax
import jax.numpy as jnp
from jax.experimental import pallas as pl
from jax.experimental.pallas import tpu as pltpu


_TARGET_BUF_BYTES = 2 * 1024 * 1024     # target padded bytes per VMEM buffer
_VMEM_LIMIT_BYTES = 32 * 1024 * 1024    # 4 buffers (in+out, double-buffered)
                                        # stay well under this on all chips
_DEFAULT_ROW_LIMIT = _TARGET_BUF_BYTES // 8   # max padded sample row for path 1


def _round_up(x, m):
    return (x + m - 1) // m * m


@functools.lru_cache(maxsize=None)
def _build_permute_fn(shape, dtype_str, perm, row_limit_bytes):
    """Return a jitted fn(x) that permutes axis 1 of x (shape `shape`) by `perm`.

    `shape`, `dtype_str`, `perm` (tuple of ints) and `row_limit_bytes` are
    hashable statics, so each configuration traces and compiles exactly once.
    """
    dtype = np.dtype(dtype_str)
    dsize = dtype.itemsize
    B, C = int(shape[0]), int(shape[1])
    N = 1
    for d in shape[2:]:
        N *= int(d)
    CN = C * N

    # ---------------------------------------------------------------- path 1
    # Whole-sample path: blocks of `bt` full rows of the (B, C*N) view.
    row_pad_bytes = _round_up(CN, 128) * dsize
    if row_pad_bytes <= row_limit_bytes:
        # Biggest bt whose sublane-padded block stays under the buffer target,
        # and is either == B or a multiple of 8 (keeps the (8,128) tile rule).
        sub_cap = max(8, (_TARGET_BUF_BYTES // row_pad_bytes) // 8 * 8)
        bt = min(B, sub_cap)

        def kernel(x_ref, o_ref):
            # Static channel loop: each copy is a (bt, N) VMEM slice move on
            # the VPU load/store slots -- never the bottleneck vs. HBM.
            for c, pc in enumerate(perm):
                o_ref[:, c * N:(c + 1) * N] = x_ref[:, pc * N:(pc + 1) * N]

        call = pl.pallas_call(
            kernel,
            out_shape=jax.ShapeDtypeStruct((B, CN), dtype),
            grid=(pl.cdiv(B, bt),),
            in_specs=[pl.BlockSpec((bt, CN), lambda b: (b, 0))],
            out_specs=pl.BlockSpec((bt, CN), lambda b: (b, 0)),
            compiler_params=pltpu.CompilerParams(
                dimension_semantics=("parallel",),
                vmem_limit_bytes=_VMEM_LIMIT_BYTES),
        )

        def fn(x):
            return call(x.reshape(B, CN)).reshape(shape)

        return jax.jit(fn)

    # ---------------------------------------------------------------- path 2
    # Per-channel path: grid (batch_tiles, C); the scalar-prefetched perm
    # table drives the input index_map (one coalesced strided DMA per step).
    if N % 128 == 0:
        SUB, LANE = N // 128, 128     # dense (sublane, lane) factoring
    else:
        SUB, LANE = 1, N              # always-legal fallback factoring
    chan_pad_bytes = _round_up(SUB, 8) * _round_up(LANE, 128) * dsize
    bt = max(1, min(B, _TARGET_BUF_BYTES // max(chan_pad_bytes, 1)))
    # TODO(synk): for single channels much larger than the VMEM budget
    # (e.g. >1024x1024 f32 per channel) also tile SUB with a third grid axis.
    perm_np = np.asarray(perm, dtype=np.int32)

    def kernel(perm_ref, x_ref, o_ref):   # perm_ref (SMEM) is used by index_maps
        o_ref[...] = x_ref[...]

    call = pl.pallas_call(
        kernel,
        out_shape=jax.ShapeDtypeStruct((B, C, SUB, LANE), dtype),
        grid_spec=pltpu.PrefetchScalarGridSpec(
            num_scalar_prefetch=1,                      # perm (C,) int32 -> SMEM
            grid=(pl.cdiv(B, bt), C),
            in_specs=[pl.BlockSpec((bt, 1, SUB, LANE),
                                   lambda b, c, perm_s: (b, perm_s[c], 0, 0))],
            out_specs=pl.BlockSpec((bt, 1, SUB, LANE),
                                   lambda b, c, perm_s: (b, c, 0, 0)),
        ),
        compiler_params=pltpu.CompilerParams(
            dimension_semantics=("parallel", "parallel"),
            vmem_limit_bytes=_VMEM_LIMIT_BYTES),
    )

    def fn(x):
        return call(jnp.asarray(perm_np), x.reshape(B, C, SUB, LANE)).reshape(shape)

    return jax.jit(fn)


class PermuteRandomPallas:
    """JAX/Pallas port of FrEIA's PermuteRandom (fixed channel permutation)."""

    def __init__(self, dims_in, seed):
        self.in_channels = dims_in[0][0]
        rng = np.random.RandomState(seed)   # matches np.random.seed(seed); permutation(C)
        self.perm_np = rng.permutation(self.in_channels)
        self.perm_inv_np = np.zeros_like(self.perm_np)
        for i, p in enumerate(self.perm_np):
            self.perm_inv_np[p] = i
        # Hashable static copies -> kernels are built once per configuration.
        self._perm_t = tuple(int(p) for p in self.perm_np)
        self._perm_inv_t = tuple(int(p) for p in self.perm_inv_np)

    def forward(self, x, rev=False, row_limit_bytes=None):
        xin = x[0]
        assert xin.shape[1] == self.in_channels
        if row_limit_bytes is None:
            row_limit_bytes = _DEFAULT_ROW_LIMIT
        perm = self._perm_inv_t if rev else self._perm_t
        fn = _build_permute_fn(tuple(int(d) for d in xin.shape),
                               str(xin.dtype), perm, int(row_limit_bytes))
        return [fn(xin)]

    def jacobian(self, x, rev=False):
        return 0.0

    def output_dims(self, input_dims):
        assert len(input_dims) == 1, 'Can only use 1 input'
        return input_dims


if __name__ == "__main__":
    B, C, H, W = 2, 4, 16, 16
    key = jax.random.PRNGKey(0)
    k0, k1, k2 = jax.random.split(key, 3)
    x = jax.random.normal(k0, (B, C, H, W), dtype=jnp.float32)

    mod = PermuteRandomPallas(dims_in=[(C, H, W)], seed=0)

    # Whole-sample path: forward + inverse round trip.
    out_fwd = mod.forward([x], rev=False)[0]
    out_rev = mod.forward([out_fwd], rev=True)[0]
    jax.block_until_ready(out_fwd)
    jax.block_until_ready(out_rev)

    ref_fwd = x[:, mod.perm_np]
    assert out_fwd.shape == (B, C, H, W)
    assert out_fwd.dtype == x.dtype
    np.testing.assert_array_equal(np.asarray(out_fwd), np.asarray(ref_fwd))
    np.testing.assert_array_equal(np.asarray(out_rev), np.asarray(x))

    # Pure-vector input (no spatial dims, N == 1, odd channel count) -- the
    # old TODO corner case, handled by the whole-sample path.
    C2 = 7
    xv = jax.random.normal(k1, (B, C2), dtype=jnp.float32)
    mod2 = PermuteRandomPallas(dims_in=[(C2,)], seed=3)
    outv = mod2.forward([xv], rev=False)[0]
    jax.block_until_ready(outv)
    np.testing.assert_array_equal(np.asarray(outv), np.asarray(xv[:, mod2.perm_np]))

    # Force the large-sample per-channel DMA path (row_limit_bytes=0):
    # aligned N (N % 128 == 0) ...
    out_pc = mod.forward([x], rev=False, row_limit_bytes=0)[0]
    jax.block_until_ready(out_pc)
    np.testing.assert_array_equal(np.asarray(out_pc), np.asarray(ref_fwd))

    # ... and ragged N (N = 60) with an odd channel count.
    C3, H3, W3 = 5, 6, 10
    x3 = jax.random.normal(k2, (B, C3, H3, W3), dtype=jnp.float32)
    mod3 = PermuteRandomPallas(dims_in=[(C3, H3, W3)], seed=7)
    out3 = mod3.forward([x3], rev=False, row_limit_bytes=0)[0]
    jax.block_until_ready(out3)
    np.testing.assert_array_equal(np.asarray(out3), np.asarray(x3[:, mod3.perm_np]))

    print("KERNEL_OK")
</pallas_src>

<mosaic_0001>
module attributes {stable_mosaic.version = 11 : i64} {
  func.func @kernel(%arg0: i32, %arg1: memref<2x1024xf32, #tpu.memory_space<vmem>>, %arg2: memref<2x1024xf32, #tpu.memory_space<vmem>>) attributes {dimension_semantics = [#tpu.dimension_semantics<parallel>], iteration_bounds = array<i64: 1>, scalar_prefetch = 0 : i64, scratch_operands = 0 : i64, tpu.core_type = #tpu.core_type<tc>, window_params = [{transform_indices = @transform_0, window_bounds = array<i64: 2, 1024>}, {transform_indices = @transform_1, window_bounds = array<i64: 2, 1024>}]} {
    %c0 = arith.constant 0 : index
    %c512 = arith.constant 512 : index
    %0 = vector.load %arg1[%c0, %c512] : memref<2x1024xf32, #tpu.memory_space<vmem>>, vector<2x256xf32>
    %c0_0 = arith.constant 0 : index
    %c0_1 = arith.constant 0 : index
    %1 = vector.load %arg2[%c0_0, %c0_1] : memref<2x1024xf32, #tpu.memory_space<vmem>>, vector<2x256xf32>
    tpu.vector_store %arg2[%c0_0, %c0_1], %0 {strides = array<i32>} : memref<2x1024xf32, #tpu.memory_space<vmem>>, vector<2x256xf32>,
    %c0_2 = arith.constant 0 : index
    %c768 = arith.constant 768 : index
    %2 = vector.load %arg1[%c0_2, %c768] : memref<2x1024xf32, #tpu.memory_space<vmem>>, vector<2x256xf32>
    %c0_3 = arith.constant 0 : index
    %c256 = arith.constant 256 : index
    %3 = vector.load %arg2[%c0_3, %c256] : memref<2x1024xf32, #tpu.memory_space<vmem>>, vector<2x256xf32>
    tpu.vector_store %arg2[%c0_3, %c256], %2 {strides = array<i32>} : memref<2x1024xf32, #tpu.memory_space<vmem>>, vector<2x256xf32>,
    %c0_4 = arith.constant 0 : index
    %c256_5 = arith.constant 256 : index
    %4 = vector.load %arg1[%c0_4, %c256_5] : memref<2x1024xf32, #tpu.memory_space<vmem>>, vector<2x256xf32>
    %c0_6 = arith.constant 0 : index
    %c512_7 = arith.constant 512 : index
    %5 = vector.load %arg2[%c0_6, %c512_7] : memref<2x1024xf32, #tpu.memory_space<vmem>>, vector<2x256xf32>
    tpu.vector_store %arg2[%c0_6, %c512_7], %4 {strides = array<i32>} : memref<2x1024xf32, #tpu.memory_space<vmem>>, vector<2x256xf32>,
    %c0_8 = arith.constant 0 : index
    %c0_9 = arith.constant 0 : index
    %6 = vector.load %arg1[%c0_8, %c0_9] : memref<2x1024xf32, #tpu.memory_space<vmem>>, vector<2x256xf32>
    %c0_10 = arith.constant 0 : index
    %c768_11 = arith.constant 768 : index
    %7 = vector.load %arg2[%c0_10, %c768_11] : memref<2x1024xf32, #tpu.memory_space<vmem>>, vector<2x256xf32>
    tpu.vector_store %arg2[%c0_10, %c768_11], %6 {strides = array<i32>} : memref<2x1024xf32, #tpu.memory_space<vmem>>, vector<2x256xf32>,
    return
  }
  func.func @transform_0(%arg0: i32) -> (i32, i32) {
    %c0_i32 = arith.constant 0 : i32
    %c0_i32_0 = arith.constant 0 : i32
    return %arg0, %c0_i32 : i32, i32
  }
  func.func @transform_1(%arg0: i32) -> (i32, i32) {
    %c0_i32 = arith.constant 0 : i32
    %c0_i32_0 = arith.constant 0 : i32
    return %arg0, %c0_i32 : i32, i32
  }
}

</mosaic_0001>

<bundles_post_ra>
// kernel: fn.1
= control target key start
LH: loop header
LB: loop body
LE: loop exit
PB: predicated region body
PF: predicated region fallthrough
CT: control target
= control target key end

     0   :  { %s48_s0 = inlined_call_operand.vmem [shape: f32[2,1024], index: 0, kind: input, shape index: {}]   ;;  %s49_s1 = inlined_call_operand.vmem [shape: f32[2,1024], index: 1, kind: output, shape index: {}]  }
   0x1   :  { %v8_v0 = vld [vmem:[%s48_s0 + $0x8] sm:$0xff]   ;;  %v12_v1 = vld [vmem:[%s48_s0 + $0x4] sm:$0xf]  ;;  %v14_v2 = vld [vmem:[%s48_s0] sm:$0xf] }
   0x2   :  { %9 = vst [vmem:[%s49_s1] sm:$0xff] %v8_v0  }
   0x3   :  { %13 = vst [vmem:[%s49_s1 + $0x8] sm:$0xf] %v12_v1 }
   0x4   :  { %15 = vst [vmem:[%s49_s1 + $0xc] sm:$0xf] %v14_v2 }

</bundles_post_ra>
